<compile_context>
chip_gen: v5e
topology: v5e:2x2
jax: 0.10.0
libtpu: 0.0.40
codegen_flags: <defaults>
</compile_context>

<pallas_src>
import jax
import jax.numpy as jnp
from jax.experimental import pallas as pl
from jax.experimental.pallas import tpu as pltpu


def _round_up(x: int, m: int) -> int:
    return ((x + m - 1) // m) * m


def _vmem_capacity_bytes() -> int:
    """Physical VMEM capacity; conservative (v7x, 64 MiB) fallback."""
    try:
        cap = getattr(pltpu.get_tpu_info(), "vmem_capacity_bytes", None)
        if cap:
            return int(cap)
    except Exception:
        pass
    return 64 * 1024 * 1024


def _plan_rows(n: int, tile_max: int, align: int, min_steps: int = 1):
    """Pick (tile, steps, padded_n) for a 1-D row/column grid.

    Pads only to `align` (not to the tile), re-balances the tile so the last
    block is (nearly) full, and forces >= min_steps grid steps when n is
    large enough (so v7x's two TensorCores can both be used).
    """
    n_al = _round_up(max(n, 1), align)
    tile_max = max(align, (tile_max // align) * align)
    steps = pl.cdiv(n_al, tile_max)
    if n_al >= min_steps * align:
        steps = max(steps, min_steps)
    tile = _round_up(pl.cdiv(n_al, steps), align)
    return tile, steps, tile * steps


# ---------------------------------------------------------------------------
# Fused Linear + ELU + hoisted bilinear projection (node level)
#   h  = ELU(x @ w + b)          (m_fc / d_fc)
#   hw = h @ w_proj              (BilinearDecoder weight, hoisted to node level)
# ---------------------------------------------------------------------------
def _linear_elu_proj_kernel(x_ref, w_ref, b_ref, wp_ref, h_ref, hw_ref):
    # bf16 operands feed the MXU directly; accumulation is f32.
    y = jnp.dot(x_ref[...], w_ref[...], preferred_element_type=jnp.float32)
    y = y + b_ref[...].astype(jnp.float32)
    # ELU(alpha=1): x if x > 0 else exp(x) - 1  (clamp exp arg to avoid inf)
    y = jnp.where(y > 0, y, jnp.exp(jnp.minimum(y, 0.0)) - 1.0)
    h = y.astype(h_ref.dtype)
    h_ref[...] = h
    hw_ref[...] = jnp.dot(h, wp_ref[...],
                          preferred_element_type=jnp.float32).astype(hw_ref.dtype)


def linear_elu_proj(x, w, b, w_proj, *, tile_n: int = 1024):
    """Returns (ELU(x @ w + b), ELU(x @ w + b) @ w_proj), both in x.dtype."""
    N, din = x.shape
    dout = w.shape[1]
    assert w.shape == (din, dout) and b.shape == (dout,)
    assert w_proj.shape == (dout, dout)

    item = jnp.dtype(x.dtype).itemsize
    align = 16 if item < 4 else 8          # bf16 packs 16 rows per sublane group

    cap = _vmem_capacity_bytes()
    budget = (3 * cap) // 8                # ~24 MiB on v7x, ~48 MiB on v5e/v6e
    w_item = jnp.dtype(w.dtype).itemsize
    fixed = 2 * (din * dout + dout * dout + dout) * w_item            # resident weights
    per_row = 2 * din * item + 4 * dout * item + 8 * dout             # x, h, hw, f32 temps
    tile_budget = max(align, ((max(budget - fixed, 0) // max(per_row, 1)) // align) * align)
    tile, steps, n_pad = _plan_rows(N, min(tile_n, tile_budget), align, min_steps=2)

    if n_pad != N:
        x = jnp.pad(x, ((0, n_pad - N), (0, 0)))

    h, hw = pl.pallas_call(
        _linear_elu_proj_kernel,
        out_shape=(jax.ShapeDtypeStruct((n_pad, dout), x.dtype),
                   jax.ShapeDtypeStruct((n_pad, dout), x.dtype)),
        grid_spec=pltpu.PrefetchScalarGridSpec(
            num_scalar_prefetch=0,
            grid=(steps,),
            in_specs=[
                pl.BlockSpec((tile, din), lambda i: (i, 0)),
                pl.BlockSpec((din, dout), lambda i: (0, 0)),    # resident
                pl.BlockSpec((1, dout), lambda i: (0, 0)),      # resident
                pl.BlockSpec((dout, dout), lambda i: (0, 0)),   # resident
            ],
            out_specs=[
                pl.BlockSpec((tile, dout), lambda i: (i, 0)),
                pl.BlockSpec((tile, dout), lambda i: (i, 0)),
            ],
        ),
        compiler_params=pltpu.CompilerParams(
            dimension_semantics=("parallel",),
            vmem_limit_bytes=cap // 2,
        ),
    )(x, w, b.reshape(1, dout), w_proj)
    return h[:N], hw[:N]


# ---------------------------------------------------------------------------
# Pair-level decoder (pure streaming): sigmoid(sum(a * b, axis=feature))
# a = (h_d @ W_dec)^T per pair, b = h_m^T per pair, both laid out (F, P) so
# the reduce is a sublane reduce and the (1, tile) output is lane-dense.
# ---------------------------------------------------------------------------
def _pair_score_kernel(a_ref, b_ref, out_ref):
    prod = a_ref[...].astype(jnp.float32) * b_ref[...]   # bf16 promoted implicitly
    s = jnp.sum(prod, axis=0, keepdims=True)             # (1, TILE) lane-dense
    out_ref[...] = jax.nn.sigmoid(s).astype(out_ref.dtype)


def pair_score(a_t, b_t, *, tile_n: int = 8192):
    """sigmoid(sum(a_t * b_t, axis=0)). a_t, b_t: (F, P). Returns (P,) f32."""
    assert a_t.shape == b_t.shape and a_t.dtype == b_t.dtype
    F, P = a_t.shape

    item = jnp.dtype(a_t.dtype).itemsize
    cap = _vmem_capacity_bytes()
    budget = (3 * cap) // 8
    # per lane column: 2 streams x 2 pipeline buffers x F x itemsize
    #                  + 2 output buffers x 4 B + ~2 f32 (F, tile) temporaries
    per_col = 4 * F * item + 8 + 8 * F
    tile_budget = max(128, ((budget // per_col) // 128) * 128)
    tile, steps, p_pad = _plan_rows(P, min(tile_n, tile_budget), 128, min_steps=2)

    if p_pad != P:
        pad = ((0, 0), (0, p_pad - P))
        a_t = jnp.pad(a_t, pad)
        b_t = jnp.pad(b_t, pad)

    out = pl.pallas_call(
        _pair_score_kernel,
        out_shape=jax.ShapeDtypeStruct((1, p_pad), jnp.float32),
        grid_spec=pltpu.PrefetchScalarGridSpec(
            num_scalar_prefetch=0,
            grid=(steps,),
            in_specs=[
                pl.BlockSpec((F, tile), lambda i: (0, i)),
                pl.BlockSpec((F, tile), lambda i: (0, i)),
            ],
            out_specs=pl.BlockSpec((1, tile), lambda i: (0, i)),
        ),
        compiler_params=pltpu.CompilerParams(
            dimension_semantics=("parallel",),
            vmem_limit_bytes=cap // 2,
        ),
    )(a_t, b_t)
    # padded columns hold sigmoid(0) = 0.5 and are dropped here
    return out.reshape(-1)[:P]


# ---------------------------------------------------------------------------
# Post-GAT forward of HardGAT (everything after h_agg = gat(G).mean(1))
# ---------------------------------------------------------------------------
def hardgat_post_gat(h_agg, d_sim, m_sim, w_d, b_d, w_m, b_m, w_dec,
                     diseases, mrnas, num_diseases):
    bf = jnp.bfloat16
    hd_in = jnp.concatenate([h_agg[:num_diseases], d_sim[:num_diseases]], 1).astype(bf)
    hm_in = jnp.concatenate([h_agg[num_diseases:], m_sim[num_diseases:]], 1).astype(bf)
    wdec_bf = w_dec.astype(bf)

    h_d, hw_d = linear_elu_proj(hd_in, w_d.astype(bf), b_d.astype(bf), wdec_bf)
    h_m, hw_m = linear_elu_proj(hm_in, w_m.astype(bf), b_m.astype(bf), wdec_bf)

    h = jnp.concatenate([h_d, h_m], axis=0)      # torch: h = cat(h_d, h_m)
    hw = jnp.concatenate([hw_d, hw_m], axis=0)   # h @ W_dec, hoisted to node level

    # Gather per-pair embeddings and present them transposed (F, P) so the
    # pair kernel reduces over sublanes and stores lane-dense.
    a_t = hw.T[:, diseases]
    b_t = h.T[:, mrnas]
    scores = pair_score(a_t, b_t)
    return scores, h, hw


if __name__ == "__main__":
    key = jax.random.PRNGKey(0)
    keys = jax.random.split(key, 10)

    # Small shapes consistent with the post-GAT part of HardGAT.forward.
    num_diseases, num_mrnas = 16, 24
    n_nodes = num_diseases + num_mrnas
    h_feats = 32
    d_sim_dim = m_sim_dim = 16
    out_dim = 128          # free hyperparameter; 128 keeps every store lane-dense
    num_pairs = 1000       # ragged (not a multiple of 128) -> exercises padding

    h_agg = jax.random.normal(keys[0], (n_nodes, h_feats), jnp.float32)
    d_sim = jax.random.normal(keys[1], (n_nodes, d_sim_dim), jnp.float32)
    m_sim = jax.random.normal(keys[2], (n_nodes, m_sim_dim), jnp.float32)

    w_d = 0.1 * jax.random.normal(keys[3], (h_feats + d_sim_dim, out_dim), jnp.float32)
    b_d = 0.1 * jax.random.normal(keys[4], (out_dim,), jnp.float32)
    w_m = 0.1 * jax.random.normal(keys[5], (h_feats + m_sim_dim, out_dim), jnp.float32)
    b_m = 0.1 * jax.random.normal(keys[6], (out_dim,), jnp.float32)
    w_dec = 0.1 * jax.random.normal(keys[7], (out_dim, out_dim), jnp.float32)

    diseases = jax.random.randint(keys[8], (num_pairs,), 0, num_diseases)
    mrnas = jax.random.randint(keys[9], (num_pairs,), num_diseases, n_nodes)

    out, h, hw = hardgat_post_gat(h_agg, d_sim, m_sim, w_d, b_d, w_m, b_m, w_dec,
                                  diseases, mrnas, num_diseases)
    jax.block_until_ready(out)

    # ---- reference checks (plain JAX f32, same bf16-rounded parameters) ----
    f32, bf = jnp.float32, jnp.bfloat16

    def elu(x):
        return jnp.where(x > 0, x, jnp.exp(jnp.minimum(x, 0.0)) - 1.0)

    hd_in32 = jnp.concatenate([h_agg[:num_diseases], d_sim[:num_diseases]], 1).astype(bf).astype(f32)
    hm_in32 = jnp.concatenate([h_agg[num_diseases:], m_sim[num_diseases:]], 1).astype(bf).astype(f32)
    wd32, bd32 = w_d.astype(bf).astype(f32), b_d.astype(bf).astype(f32)
    wm32, bm32 = w_m.astype(bf).astype(f32), b_m.astype(bf).astype(f32)
    wdec32 = w_dec.astype(bf).astype(f32)

    hd_ref = elu(hd_in32 @ wd32 + bd32)
    hm_ref = elu(hm_in32 @ wm32 + bm32)
    h_ref = jnp.concatenate([hd_ref, hm_ref], axis=0)

    # node-level kernel (linear + ELU + hoisted projection)
    assert jnp.allclose(h.astype(f32), h_ref, atol=2e-2, rtol=2e-2)
    assert jnp.allclose(hw.astype(f32), h.astype(f32) @ wdec32, atol=1e-2, rtol=2e-2)

    # pair kernel exactness (same bf16 node embeddings, f32 math)
    pair_ref = jax.nn.sigmoid(
        jnp.sum(hw.astype(f32)[diseases] * h.astype(f32)[mrnas], axis=1))
    assert out.shape == (num_pairs,)
    assert jnp.allclose(out, pair_ref, atol=2e-3)

    # end-to-end vs torch-style reference: sigmoid(sum((h[d] @ W) * h[m], 1))
    full_ref = jax.nn.sigmoid(jnp.sum((h_ref[diseases] @ wdec32) * h_ref[mrnas], axis=1))
    assert jnp.allclose(out, full_ref, atol=6e-2)

    print("KERNEL_OK")
</pallas_src>

<mosaic_0001>
module attributes {stable_mosaic.version = 11 : i64} {
  func.func @_linear_elu_proj_kernel(%arg0: i32, %arg1: memref<16x48xbf16, #tpu.memory_space<vmem>>, %arg2: memref<48x128xbf16, #tpu.memory_space<vmem>>, %arg3: memref<1x128xbf16, #tpu.memory_space<vmem>>, %arg4: memref<128x128xbf16, #tpu.memory_space<vmem>>, %arg5: memref<16x128xbf16, #tpu.memory_space<vmem>>, %arg6: memref<16x128xbf16, #tpu.memory_space<vmem>>) attributes {dimension_semantics = [#tpu.dimension_semantics<parallel>], iteration_bounds = array<i64: 1>, scalar_prefetch = 0 : i64, scratch_operands = 0 : i64, tpu.core_type = #tpu.core_type<tc>, window_params = [{transform_indices = @transform_0, window_bounds = array<i64: 16, 48>}, {pipeline_mode = #tpu.pipeline_mode<synchronous>, transform_indices = @transform_1, window_bounds = array<i64: 48, 128>}, {pipeline_mode = #tpu.pipeline_mode<synchronous>, transform_indices = @transform_2, window_bounds = array<i64: 1, 128>}, {pipeline_mode = #tpu.pipeline_mode<synchronous>, transform_indices = @transform_3, window_bounds = array<i64: 128, 128>}, {transform_indices = @transform_4, window_bounds = array<i64: 16, 128>}, {transform_indices = @transform_5, window_bounds = array<i64: 16, 128>}]} {
    %c0 = arith.constant 0 : index
    %c0_0 = arith.constant 0 : index
    %0 = vector.load %arg1[%c0, %c0_0] : memref<16x48xbf16, #tpu.memory_space<vmem>>, vector<16x48xbf16>
    %c0_1 = arith.constant 0 : index
    %c0_2 = arith.constant 0 : index
    %1 = vector.load %arg2[%c0_1, %c0_2] : memref<48x128xbf16, #tpu.memory_space<vmem>>, vector<48x128xbf16>
    %cst = arith.constant dense<0.000000e+00> : vector<16x128xf32>
    %2 = tpu.matmul %0, %1, %cst {dimension_numbers = #tpu.dot_dimension_numbers<[1], [0], [0], [1], [0, 0, 1, 1], [], []>} : vector<16x48xbf16>, vector<48x128xbf16>, vector<16x128xf32> -> vector<16x128xf32>
    %c0_3 = arith.constant 0 : index
    %c0_4 = arith.constant 0 : index
    %3 = vector.load %arg3[%c0_3, %c0_4] : memref<1x128xbf16, #tpu.memory_space<vmem>>, vector<1x128xbf16>
    %4 = arith.extf %3 : vector<1x128xbf16> to vector<1x128xf32>
    %5 = vector.broadcast %4 : vector<1x128xf32> to vector<16x128xf32>
    %6 = arith.addf %2, %5 : vector<16x128xf32>
    %cst_5 = arith.constant 0.000000e+00 : f32
    %7 = vector.broadcast %cst_5 : f32 to vector<16x128xf32>
    %8 = arith.cmpf ogt, %6, %7 : vector<16x128xf32>
    %cst_6 = arith.constant 0.000000e+00 : f32
    %9 = vector.broadcast %cst_6 : f32 to vector<16x128xf32>
    %10 = arith.minimumf %6, %9 : vector<16x128xf32>
    %11 = math.exp %10 : vector<16x128xf32>
    %cst_7 = arith.constant 1.000000e+00 : f32
    %12 = vector.broadcast %cst_7 : f32 to vector<16x128xf32>
    %13 = arith.subf %11, %12 : vector<16x128xf32>
    %14 = arith.select %8, %6, %13 : vector<16x128xi1>, vector<16x128xf32>
    %15 = arith.truncf %14 : vector<16x128xf32> to vector<16x128xbf16>
    %c0_8 = arith.constant 0 : index
    %c0_9 = arith.constant 0 : index
    %16 = vector.load %arg5[%c0_8, %c0_9] : memref<16x128xbf16, #tpu.memory_space<vmem>>, vector<16x128xbf16>
    tpu.vector_store %arg5[%c0_8, %c0_9], %15 {strides = array<i32>} : memref<16x128xbf16, #tpu.memory_space<vmem>>, vector<16x128xbf16>,
    %c0_10 = arith.constant 0 : index
    %c0_11 = arith.constant 0 : index
    %17 = vector.load %arg4[%c0_10, %c0_11] : memref<128x128xbf16, #tpu.memory_space<vmem>>, vector<128x128xbf16>
    %cst_12 = arith.constant dense<0.000000e+00> : vector<16x128xf32>
    %18 = tpu.matmul %15, %17, %cst_12 {dimension_numbers = #tpu.dot_dimension_numbers<[1], [0], [0], [1], [0, 0, 1, 1], [], []>} : vector<16x128xbf16>, vector<128x128xbf16>, vector<16x128xf32> -> vector<16x128xf32>
    %19 = arith.truncf %18 : vector<16x128xf32> to vector<16x128xbf16>
    %c0_13 = arith.constant 0 : index
    %c0_14 = arith.constant 0 : index
    %20 = vector.load %arg6[%c0_13, %c0_14] : memref<16x128xbf16, #tpu.memory_space<vmem>>, vector<16x128xbf16>
    tpu.vector_store %arg6[%c0_13, %c0_14], %19 {strides = array<i32>} : memref<16x128xbf16, #tpu.memory_space<vmem>>, vector<16x128xbf16>,
    return
  }
  func.func @transform_0(%arg0: i32) -> (i32, i32) {
    %c0_i32 = arith.constant 0 : i32
    %c0_i32_0 = arith.constant 0 : i32
    return %arg0, %c0_i32 : i32, i32
  }
  func.func @transform_1(%arg0: i32) -> (i32, i32) {
    %c0_i32 = arith.constant 0 : i32
    %c0_i32_0 = arith.constant 0 : i32
    %c0_i32_1 = arith.constant 0 : i32
    return %c0_i32, %c0_i32_0 : i32, i32
  }
  func.func @transform_2(%arg0: i32) -> (i32, i32) {
    %c0_i32 = arith.constant 0 : i32
    %c0_i32_0 = arith.constant 0 : i32
    %c0_i32_1 = arith.constant 0 : i32
    return %c0_i32, %c0_i32_0 : i32, i32
  }
  func.func @transform_3(%arg0: i32) -> (i32, i32) {
    %c0_i32 = arith.constant 0 : i32
    %c0_i32_0 = arith.constant 0 : i32
    %c0_i32_1 = arith.constant 0 : i32
    return %c0_i32, %c0_i32_0 : i32, i32
  }
  func.func @transform_4(%arg0: i32) -> (i32, i32) {
    %c0_i32 = arith.constant 0 : i32
    %c0_i32_0 = arith.constant 0 : i32
    return %arg0, %c0_i32 : i32, i32
  }
  func.func @transform_5(%arg0: i32) -> (i32, i32) {
    %c0_i32 = arith.constant 0 : i32
    %c0_i32_0 = arith.constant 0 : i32
    return %arg0, %c0_i32 : i32, i32
  }
}

</mosaic_0001>

<bundles_post_ra>
// kernel: tpu_custom_call.1
= control target key start
LH: loop header
LB: loop body
LE: loop exit
PB: predicated region body
PF: predicated region fallthrough
CT: control target
= control target key end

     0   :  { %11 = vsyncpa [#allocation3], 0  ;;  %s545_s0 = inlined_call_operand.hbm [shape: bf16[16,48], index: 0, kind: input, shape index: {}]   ;;  %s546_s1 = inlined_call_operand.hbm [shape: bf16[48,128], index: 1, kind: input, shape index: {}]   ;;  %s547_s2 = inlined_call_operand.vmem [shape: bf16[1,128], index: 2, kind: input, shape index: {}]   ;;  %s548_s3 = inlined_call_operand.hbm [shape: bf16[128,128], index: 3, kind: input, shape index: {}]   ;;  %s549_s4 = inlined_call_operand.hbm [shape: bf16[16,128], index: 4, kind: output, shape index: {0}]   ;;  %s550_s5 = inlined_call_operand.hbm [shape: bf16[16,128], index: 5, kind: output, shape index: {1}]  }
   0x1   :  { %12 = vsyncpa [#allocation6], 0 }
   0x2   :  { %13 = vsyncpa [#allocation4], 0 }
   0x3   :  { %14 = vsyncpa [#allocation10], 0  ;;  %s32_s20 = sshll.u32 %s546_s1, 4  ;;  %s475_s21 = smov [#allocation5]   ;;  %s33_s20 = int_to_ptr.hbm [resolvable:$true] %s32_s20 }
   0x4   :  { %s34_s22 = sshll.u32 %s475_s21, 4  ;;  %s19_s25 = sshll.u32 %s545_s0, 4  ;;  %s35_s22 = int_to_ptr.vmem [resolvable:$true] %s34_s22  ;;  %s20_s25 = int_to_ptr.hbm [resolvable:$true] %s19_s25 }
   0x5   :  { %s476_s26 = smov 64   ;;  %s477_s27 = smov 4  }
   0x6   :  { %40 = dma.hbm_to_vmem [thread:$0]  %s33_s20, 384, %s35_s22, [#allocation6], %s476_s26, %s476_s26, %s477_s27  }
   0x7   :  { %s478_s28 = smov [#allocation2]   ;;  %s47_s1 = sshll.u32 %s548_s3, 4  ;;  %s48_s1 = int_to_ptr.hbm [resolvable:$true] %s47_s1 }
   0x8   :  { %s21_s29 = sshll.u32 %s478_s28, 4  ;;  %s479_s0 = smov [#allocation7]   ;;  %s22_s29 = int_to_ptr.vmem [resolvable:$true] %s21_s29 }
   0x9   :  { %27 = dma.hbm_to_vmem [thread:$0]  %s20_s25, 128, %s22_s29, [#allocation3], %s476_s26, %s476_s26, %s477_s27  }
   0xa   :  { %s49_s7 = sshll.u32 %s479_s0, 4  ;;  %s50_s7 = int_to_ptr.vmem [resolvable:$true] %s49_s7 }
   0xb   :  { %55 = dma.hbm_to_vmem [thread:$0]  %s48_s1, 1024, %s50_s7, [#allocation6], %s476_s26, %s476_s26, %s477_s27  }
   0xc   :  { %467 = dma.done.wait [#allocation3], 128  }
   0xd   :  { %468 = vsyncadd [#allocation3], 4294967168 }
   0xe   :  { %469 = dma.done.wait [#allocation6], 1408  }
   0xf   :  { %470 = vsyncadd [#allocation6], 4294965888  ;;  %v317_v0 = vld [vmem:[#allocation5 + $0x10] sm:$0xff]  ;;  %v316_v1 = vld [vmem:[#allocation5 + $0x8] sm:$0xff]  ;;  %vm103_vm0 = vcmask 392192   ;;  %s231_s12 = sshll.u32 %s549_s4, 4  ;;  %s232_s12 = int_to_ptr.hbm [resolvable:$true] %s231_s12 }
  0x10   :  { %112 = vmatpush.bf16.msra.mxu0 %v317_v0  ;;  %v315_v2 = vld [vmem:[#allocation5] sm:$0xff]  ;;  %v314_v3 = vld [vmem:[#allocation2] sm:$0xff]  ;;  %v325_v4 = vld [vmem:[#allocation7 + $0x38] sm:$0xff]  ;;  %s481_s13 = smov [#allocation9]   ;;  %s244_s17 = sshll.u32 %s550_s5, 4  ;;  %s245_s17 = int_to_ptr.hbm [resolvable:$true] %s244_s17 }
  0x11   :  { %207 = vmatpush.bf16.msra.mxu1 %v325_v4  ;;  %v324_v5 = vld [vmem:[#allocation7 + $0x30] sm:$0xff]  ;;  %v323_v6 = vld [vmem:[#allocation7 + $0x28] sm:$0xff]  ;;  %v322_v7 = vld [vmem:[#allocation7 + $0x20] sm:$0xff]  ;;  %s242_s14 = sshll.u32 %s481_s13, 4  ;;  %s243_s14 = int_to_ptr.vmem [resolvable:$true] %s242_s14 }
  0x12   :  { %v321_v8 = vld [vmem:[#allocation7 + $0x18] sm:$0xff]  ;;  %v320_v9 = vld [vmem:[#allocation7 + $0x10] sm:$0xff]  ;;  %v77_v10 = vld [vmem:[%s547_s2] sm:$0x1]  ;;  %s480_s2 = smov [#allocation8]  }
  0x13   :  { %v319_v11 = vld [vmem:[#allocation7 + $0x8] sm:$0xff]  ;;  %v318_v12 = vld [vmem:[#allocation7] sm:$0xff]  ;;  %v78_v13 = vunpack.c.l.bf16 %v77_v10  ;;  %s229_s9 = sshll.u32 %s480_s2, 4  ;;  %s230_s9 = int_to_ptr.vmem [resolvable:$true] %s229_s9 }
  0x14   :  { %113 = vmatpush.bf16.msra.mxu0 %v316_v1 }
  0x15   :  { %208 = vmatpush.bf16.msra.mxu1 %v324_v5  ;;  %v79_v14 = vperm.slane %v78_v13, 0 }
  0x18   :  { %114 = vmatpush.bf16.msra.mxu0 %v315_v2 }
  0x19   :  { %209 = vmatpush.bf16.msra.mxu1 %v323_v6 }
  0x1b   :  { %279 = vmatmul.msk.bf16.vlgmr.msra.gmra.mxu0 %vm103_vm0, %v314_v3 }
  0x1d   :  { %210 = vmatpush.bf16.msra.mxu1 %v322_v7 }
  0x21   :  { %211 = vmatpush.bf16.msra.mxu1 %v321_v8 }
  0x25   :  { %212 = vmatpush.bf16.msra.mxu1 %v320_v9 }
  0x29   :  { %213 = vmatpush.bf16.msra.mxu1 %v319_v11 }
  0x2d   :  { %214 = vmatpush.bf16.msra.mxu1 %v318_v12 }
  0x98   :  { %v116_v15 = vpop.f32.mrf.mxu0 }
  0x99   :  { %v117_v16 = vadd.f32 %v116_v15, %v79_v14 }
  0x9b   :  { %v123_v17 = vmin.f32 %v117_v16, 0.0  ;;  %vm121_vm1 = vcmp.gt.f32.partialorder %v117_v16, 0.0 }
  0x9d   :  { %v125_v18 = vmul.f32 1.442695, %v123_v17 }
  0x9f   :  { %343 = vpow2.f32 %v125_v18 }
  0xa0   :  { %v118_v19 = vpop.f32.mrf.mxu0 }
  0xa1   :  { %v119_v20 = vadd.f32 %v118_v19, %v79_v14 }
  0xa3   :  { %v124_v21 = vmin.f32 %v119_v20, 0.0  ;;  %vm122_vm2 = vcmp.gt.f32.partialorder %v119_v20, 0.0 }
  0xa5   :  { %v344_v22 = vpop.eup %343  ;;  %v127_v23 = vmul.f32 1.442695, %v124_v21 }
  0xa6   :  { %v280_v24 = vadd.f32 -1.0, %v344_v22 }
  0xa7   :  { %345 = vpow2.f32 %v127_v23 }
  0xa8   :  { %v131_v25 = vsel %vm121_vm1, %v117_v16, %v280_v24 }
  0xa9   :  { %v133_v28 = vpack.c.bf16 %v131_v25, %v131_v25 }
  0xab   :  { %v155_v32 = vunpack.c.l.b16 %v133_v28 }
  0xad   :  { %v346_v26 = vpop.eup %345 }
  0xae   :  { %v281_v27 = vadd.f32 -1.0, %v346_v26 }
  0xb0   :  { %v132_v29 = vsel %vm122_vm2, %v119_v20, %v281_v27 }
  0xb1   :  { %v134_v30 = vpack.c.bf16 %v132_v29, %v132_v29  ;;  %v329_v31 = vpack.c.bf16 %v132_v29, %v131_v25 }
  0xb3   :  { %v156_v33 = vunpack.c.l.b16 %v134_v30  ;;  %330 = vst [vmem:[#allocation8] sm:$0xff] %v329_v31  }
  0xb4   :  { %237 = dma.vmem_to_hbm [thread:$0]  %s230_s9, 128, %s232_s12, [#allocation4], %s476_s26, %s476_s26, %s477_s27  }
  0xb5   :  { %v157_v34 = vpack.c.b16 %v156_v33, %v155_v32 }
  0xb7   :  { %215 = vmatmul.bf16.vlgmr.msra.gmra.mxu1 %v157_v34 }
 0x134   :  { %v216_v35 = vpop.f32.mrf.mxu1 }
 0x13c   :  { %v218_v36 = vpop.f32.mrf.mxu1 }
 0x13d   :  { %v334_v37 = vpack.c.bf16 %v218_v36, %v216_v35 }
 0x13f   :  { %335 = vst [vmem:[#allocation9] sm:$0xff] %v334_v37  }
 0x140   :  { %250 = dma.vmem_to_hbm [thread:$0]  %s243_s14, 128, %s245_s17, [#allocation10], %s476_s26, %s476_s26, %s477_s27  }
 0x141   :  { %471 = dma.done.wait [#allocation4], 128  }
 0x142   :  { %472 = vsyncadd [#allocation4], 4294967168 }
 0x143   :  { %473 = dma.done.wait [#allocation10], 128  }
 0x144   :  { %474 = vsyncadd [#allocation10], 4294967168 }
 0x145   :  { %259 = vsyncpa [#allocation3], 1 }
 0x146   :  { %260 = vsyncpa [#allocation6], 1 }
 0x147   :  { %261 = vsyncpa [#allocation4], 1 }
 0x148   :  { %262 = vsyncpa [#allocation10], 1 }

</bundles_post_ra>
